<compile_context>
chip_gen: v6e
topology: v6e:2x2x1
jax: 0.10.0
libtpu: 0.0.40
codegen_flags: <defaults>
</compile_context>

<pallas_src>
import functools

import jax
import jax.numpy as jnp
from jax.experimental import pallas as pl
from jax.experimental.pallas import tpu as pltpu


def _actor_critic_kernel(num_actions, x_ref, w1_ref, b1_ref, w2_ref, b2_ref,
                         out_ref):
    # x: (TB, D)  w1: (D, 2H)  b1: (1, 2H)  w2: (2H, NP)  b2: (1, NP)
    # out: (TB, NP)  where NP is a multiple of 128 (lane-dense output).
    x = x_ref[...]

    # ---- fused layer 1: one MXU pass produces [h_actor | h_critic] ----
    h = jnp.dot(x, w1_ref[...], preferred_element_type=jnp.float32)
    h = jnp.maximum(h + b1_ref[...], 0.0)                      # (TB, 2H) f32
    h = h.astype(w2_ref.dtype)                                 # bf16 path: keep MXU native

    # ---- fused layer 2 (block-diag, lane-padded): one MXU pass ----
    # columns [0, A) = actor logits, column A = critic value, rest = pads.
    y = jnp.dot(h, w2_ref[...], preferred_element_type=jnp.float32)
    y = y + b2_ref[...]                                        # (TB, NP) f32

    # Column mask (no column slicing, no partial stores).
    col = jax.lax.broadcasted_iota(jnp.int32, y.shape, 1)
    is_logit = col < num_actions

    # ---- numerically stable softmax over the action-logit columns only ----
    logits = jnp.where(is_logit, y, jnp.float32(-1e30))        # finite, no NaN risk
    m = jnp.max(logits, axis=1, keepdims=True)
    e = jnp.exp(logits - m)                                    # pads -> exp(-huge) = 0
    denom = jnp.sum(e, axis=1, keepdims=True)
    r = pl.reciprocal(denom, approx=True)                      # EUP vrcp (free slot)
    r = r * (2.0 - denom * r)                                  # one Newton step -> ~f32 accuracy
    probs = e * r

    # Single full-width, unmasked store: [probs | value | pads].
    out_ref[...] = jnp.where(is_logit, probs, y)


def _block_plan(batch):
    """Pick (B_pad, TB, nb): one block when small, exactly 2 blocks (one per
    TensorCore on v7x) when large, capped at MAX_TB rows for VMEM headroom."""
    MAX_TB = 2048
    b8 = max(8, ((batch + 7) // 8) * 8)        # sublane multiple
    if b8 <= 256:
        return b8, b8, 1                       # single block, minimum grid steps
    nb = 2
    while (b8 + nb - 1) // nb > MAX_TB:
        nb *= 2
    tb = (((b8 + nb - 1) // nb + 7) // 8) * 8
    return tb * nb, tb, nb


def actor_critic_forward(x, fused):
    """x: (B, D) float32. fused: dict from fuse_params() with pre-fused weights.

    Returns (probs (B, A), values (B, 1)) in float32.
    """
    B, D = x.shape
    A = fused["num_actions"]
    NP = fused["out_cols"]
    H2 = fused["w1"].shape[1]

    B_pad, TB, nb = _block_plan(B)

    xd = x.astype(fused["w1"].dtype)
    if B_pad != B:
        xd = jnp.pad(xd, ((0, B_pad - B), (0, 0)))

    itemsize = jnp.dtype(fused["w1"].dtype).itemsize
    cost = pl.CostEstimate(
        flops=2 * B_pad * (D * H2 + H2 * NP),
        transcendentals=B_pad * NP,
        bytes_accessed=(B_pad * D + D * H2 + H2 * NP) * itemsize
        + (B_pad * NP + H2 + NP) * 4,
    )

    out = pl.pallas_call(
        functools.partial(_actor_critic_kernel, A),
        grid=(nb,),
        in_specs=[
            pl.BlockSpec((TB, D), lambda i: (i, 0)),     # x rows for this block
            pl.BlockSpec((D, H2), lambda i: (0, 0)),     # fused layer-1 weight (resident)
            pl.BlockSpec((1, H2), lambda i: (0, 0)),     # fused layer-1 bias
            pl.BlockSpec((H2, NP), lambda i: (0, 0)),    # fused lane-padded layer-2 weight
            pl.BlockSpec((1, NP), lambda i: (0, 0)),     # fused layer-2 bias
        ],
        out_specs=pl.BlockSpec((TB, NP), lambda i: (i, 0)),
        out_shape=jax.ShapeDtypeStruct((B_pad, NP), jnp.float32),
        compiler_params=pltpu.CompilerParams(
            dimension_semantics=("parallel",)),
        cost_estimate=cost,
    )(xd, fused["w1"], fused["b1"], fused["w2"], fused["b2"])

    probs = out[:B, :A]
    values = out[:B, A:A + 1]
    return probs, values


def init_params(key, num_inputs, num_outputs, hidden=(32, 32)):
    """Deterministic init matching the shapes implied by ActorCritic.__init__.
    Weights stored as (in, out); biases as (1, out)."""
    ks = jax.random.split(key, 8)
    h0, h1 = hidden

    def lin(kw, kb, fan_in, fan_out):
        bound = 1.0 / jnp.sqrt(fan_in)
        w = jax.random.uniform(kw, (fan_in, fan_out), jnp.float32, -bound, bound)
        b = jax.random.uniform(kb, (1, fan_out), jnp.float32, -bound, bound)
        return w, b

    wa1, ba1 = lin(ks[0], ks[1], num_inputs, h0)
    wa2, ba2 = lin(ks[2], ks[3], h1, num_outputs)
    wc1, bc1 = lin(ks[4], ks[5], num_inputs, h0)
    wc2, bc2 = lin(ks[6], ks[7], h1, 1)
    return dict(wa1=wa1, ba1=ba1, wa2=wa2, ba2=ba2,
                wc1=wc1, bc1=bc1, wc2=wc2, bc2=bc2)


def fuse_params(p, dtype=jnp.float32):
    """Hoisted (init-time) weight fusion: done once, reused every forward call.

    w1 = [wa1 | wc1]                                : (D, 2H)
    b1 = [ba1 | bc1]                                : (1, 2H)
    w2 = lane-dense padded block-diagonal           : (2H, NP), NP multiple of 128
         cols [0, A) -> actor logits, col A -> critic value, rest -> zeros
    b2 = matching padded bias                       : (1, NP)

    Weights may be cast to bf16 (MXU-native on v6e/v7x); biases stay f32 since
    the bias/ReLU/softmax epilogue runs in f32.
    """
    H = p["wa1"].shape[1]
    A = p["wa2"].shape[1]
    NP = ((A + 1 + 127) // 128) * 128            # lane-dense output width

    w1 = jnp.concatenate([p["wa1"], p["wc1"]], axis=1)
    b1 = jnp.concatenate([p["ba1"], p["bc1"]], axis=1)

    w2 = jnp.zeros((2 * H, NP), jnp.float32)
    w2 = w2.at[:H, :A].set(p["wa2"])
    w2 = w2.at[H:, A].set(p["wc2"][:, 0])
    b2 = jnp.zeros((1, NP), jnp.float32)
    b2 = b2.at[:, :A].set(p["ba2"])
    b2 = b2.at[:, A].set(p["bc2"][0, 0])

    return dict(w1=w1.astype(dtype), b1=b1,
                w2=w2.astype(dtype), b2=b2,
                num_actions=A, out_cols=NP)


def reference_forward(x, p):
    """Pure-JAX reference (unfused) for verification."""
    h_a = jnp.maximum(x @ p["wa1"] + p["ba1"], 0.0)
    logits = h_a @ p["wa2"] + p["ba2"]
    probs = jax.nn.softmax(logits, axis=1)
    h_c = jnp.maximum(x @ p["wc1"] + p["bc1"], 0.0)
    values = h_c @ p["wc2"] + p["bc2"]
    return probs, values


if __name__ == "__main__":
    key = jax.random.PRNGKey(0)
    k_x, k_p = jax.random.split(key)

    # Deliberately NOT a multiple of 128 to exercise the padded/ragged path.
    B = 200
    NUM_INPUTS = 32   # observation-space size
    NUM_OUTPUTS = 8   # number of actions
    HIDDEN = (32, 32)

    x = jax.random.normal(k_x, (B, NUM_INPUTS), dtype=jnp.float32)
    params = init_params(k_p, NUM_INPUTS, NUM_OUTPUTS, HIDDEN)
    ref_probs, ref_values = reference_forward(x, params)

    # ---- f32 path: tight parity with the unfused reference ----
    fused_f32 = fuse_params(params, dtype=jnp.float32)   # hoisted out of hot path
    probs, values = actor_critic_forward(x, fused_f32)
    jax.block_until_ready((probs, values))

    assert probs.shape == (B, NUM_OUTPUTS) and values.shape == (B, 1)
    assert jnp.allclose(probs, ref_probs, atol=1e-5), "probs mismatch (f32)"
    assert jnp.allclose(values, ref_values, atol=1e-5), "values mismatch (f32)"
    assert jnp.allclose(jnp.sum(probs, axis=1), 1.0, atol=1e-5), "probs not normalized"

    # ---- bf16 path: MXU-native on v6e/v7x (f32 accumulation + f32 epilogue) ----
    fused_bf16 = fuse_params(params, dtype=jnp.bfloat16)
    probs_b, values_b = actor_critic_forward(x, fused_bf16)
    jax.block_until_ready((probs_b, values_b))

    assert probs_b.shape == (B, NUM_OUTPUTS) and values_b.shape == (B, 1)
    assert jnp.allclose(probs_b, ref_probs, atol=5e-2), "probs mismatch (bf16)"
    assert jnp.allclose(values_b, ref_values, atol=1e-1), "values mismatch (bf16)"
    assert jnp.allclose(jnp.sum(probs_b, axis=1), 1.0, atol=1e-3), "bf16 probs not normalized"

    print("KERNEL_OK")
</pallas_src>

<mosaic_0001>
module attributes {stable_mosaic.version = 11 : i64} {
  func.func @_actor_critic_kernel(%arg0: i32, %arg1: memref<200x32xf32, #tpu.memory_space<vmem>>, %arg2: memref<32x64xf32, #tpu.memory_space<vmem>>, %arg3: memref<1x64xf32, #tpu.memory_space<vmem>>, %arg4: memref<64x128xf32, #tpu.memory_space<vmem>>, %arg5: memref<1x128xf32, #tpu.memory_space<vmem>>, %arg6: memref<200x128xf32, #tpu.memory_space<vmem>>) attributes {dimension_semantics = [#tpu.dimension_semantics<parallel>], iteration_bounds = array<i64: 1>, scalar_prefetch = 0 : i64, scratch_operands = 0 : i64, tpu.core_type = #tpu.core_type<tc>, window_params = [{transform_indices = @transform_0, window_bounds = array<i64: 200, 32>}, {pipeline_mode = #tpu.pipeline_mode<synchronous>, transform_indices = @transform_1, window_bounds = array<i64: 32, 64>}, {pipeline_mode = #tpu.pipeline_mode<synchronous>, transform_indices = @transform_2, window_bounds = array<i64: 1, 64>}, {pipeline_mode = #tpu.pipeline_mode<synchronous>, transform_indices = @transform_3, window_bounds = array<i64: 64, 128>}, {pipeline_mode = #tpu.pipeline_mode<synchronous>, transform_indices = @transform_4, window_bounds = array<i64: 1, 128>}, {transform_indices = @transform_5, window_bounds = array<i64: 200, 128>}]} {
    %c0 = arith.constant 0 : index
    %c0_0 = arith.constant 0 : index
    %0 = vector.load %arg1[%c0, %c0_0] : memref<200x32xf32, #tpu.memory_space<vmem>>, vector<200x32xf32>
    %c0_1 = arith.constant 0 : index
    %c0_2 = arith.constant 0 : index
    %1 = vector.load %arg2[%c0_1, %c0_2] : memref<32x64xf32, #tpu.memory_space<vmem>>, vector<32x64xf32>
    %cst = arith.constant dense<0.000000e+00> : vector<200x64xf32>
    %2 = tpu.matmul %0, %1, %cst {dimension_numbers = #tpu.dot_dimension_numbers<[1], [0], [0], [1], [0, 0, 1, 1], [], []>} : vector<200x32xf32>, vector<32x64xf32>, vector<200x64xf32> -> vector<200x64xf32>
    %c0_3 = arith.constant 0 : index
    %c0_4 = arith.constant 0 : index
    %3 = vector.load %arg3[%c0_3, %c0_4] : memref<1x64xf32, #tpu.memory_space<vmem>>, vector<1x64xf32>
    %4 = vector.broadcast %3 : vector<1x64xf32> to vector<200x64xf32>
    %5 = arith.addf %2, %4 : vector<200x64xf32>
    %cst_5 = arith.constant 0.000000e+00 : f32
    %6 = vector.broadcast %cst_5 : f32 to vector<200x64xf32>
    %7 = arith.maximumf %5, %6 : vector<200x64xf32>
    %c0_6 = arith.constant 0 : index
    %c0_7 = arith.constant 0 : index
    %8 = vector.load %arg4[%c0_6, %c0_7] : memref<64x128xf32, #tpu.memory_space<vmem>>, vector<64x128xf32>
    %cst_8 = arith.constant dense<0.000000e+00> : vector<200x128xf32>
    %9 = tpu.matmul %7, %8, %cst_8 {dimension_numbers = #tpu.dot_dimension_numbers<[1], [0], [0], [1], [0, 0, 1, 1], [], []>} : vector<200x64xf32>, vector<64x128xf32>, vector<200x128xf32> -> vector<200x128xf32>
    %c0_9 = arith.constant 0 : index
    %c0_10 = arith.constant 0 : index
    %10 = vector.load %arg5[%c0_9, %c0_10] : memref<1x128xf32, #tpu.memory_space<vmem>>, vector<1x128xf32>
    %11 = vector.broadcast %10 : vector<1x128xf32> to vector<200x128xf32>
    %12 = arith.addf %9, %11 : vector<200x128xf32>
    %13 = tpu.iota {dimensions = array<i32: 1>} : vector<200x128xi32>
    %c8_i32 = arith.constant 8 : i32
    %14 = vector.broadcast %c8_i32 : i32 to vector<200x128xi32>
    %15 = arith.cmpi slt, %13, %14 : vector<200x128xi32>
    %cst_11 = arith.constant -1.000000e+30 : f32
    %16 = vector.broadcast %cst_11 : f32 to vector<200x128xf32>
    %17 = arith.select %15, %12, %16 : vector<200x128xi1>, vector<200x128xf32>
    %cst_12 = arith.constant dense<0xFF800000> : vector<200xf32>
    %18 = vector.multi_reduction <maximumf>, %17, %cst_12 [1] : vector<200x128xf32> to vector<200xf32>
    %19 = vector.shape_cast %18 : vector<200xf32> to vector<200x1xf32>
    %20 = vector.broadcast %19 : vector<200x1xf32> to vector<200x128xf32>
    %21 = arith.subf %17, %20 : vector<200x128xf32>
    %22 = math.exp %21 : vector<200x128xf32>
    %cst_13 = arith.constant dense<0.000000e+00> : vector<200xf32>
    %23 = vector.multi_reduction <add>, %22, %cst_13 [1] : vector<200x128xf32> to vector<200xf32>
    %24 = vector.shape_cast %23 : vector<200xf32> to vector<200x1xf32>
    %25 = tpu.reciprocal %24 {approx = true} : vector<200x1xf32> -> vector<200x1xf32>
    %26 = arith.mulf %24, %25 : vector<200x1xf32>
    %cst_14 = arith.constant 2.000000e+00 : f32
    %27 = vector.broadcast %cst_14 : f32 to vector<200x1xf32>
    %28 = arith.subf %27, %26 : vector<200x1xf32>
    %29 = arith.mulf %25, %28 : vector<200x1xf32>
    %30 = vector.broadcast %29 : vector<200x1xf32> to vector<200x128xf32>
    %31 = arith.mulf %22, %30 : vector<200x128xf32>
    %32 = arith.select %15, %31, %12 : vector<200x128xi1>, vector<200x128xf32>
    %c0_15 = arith.constant 0 : index
    %c0_16 = arith.constant 0 : index
    %33 = vector.load %arg6[%c0_15, %c0_16] : memref<200x128xf32, #tpu.memory_space<vmem>>, vector<200x128xf32>
    tpu.vector_store %arg6[%c0_15, %c0_16], %32 {strides = array<i32>} : memref<200x128xf32, #tpu.memory_space<vmem>>, vector<200x128xf32>,
    return
  }
  func.func @transform_0(%arg0: i32) -> (i32, i32) {
    %c0_i32 = arith.constant 0 : i32
    %c0_i32_0 = arith.constant 0 : i32
    return %arg0, %c0_i32 : i32, i32
  }
  func.func @transform_1(%arg0: i32) -> (i32, i32) {
    %c0_i32 = arith.constant 0 : i32
    %c0_i32_0 = arith.constant 0 : i32
    %c0_i32_1 = arith.constant 0 : i32
    return %c0_i32, %c0_i32_0 : i32, i32
  }
  func.func @transform_2(%arg0: i32) -> (i32, i32) {
    %c0_i32 = arith.constant 0 : i32
    %c0_i32_0 = arith.constant 0 : i32
    %c0_i32_1 = arith.constant 0 : i32
    return %c0_i32, %c0_i32_0 : i32, i32
  }
  func.func @transform_3(%arg0: i32) -> (i32, i32) {
    %c0_i32 = arith.constant 0 : i32
    %c0_i32_0 = arith.constant 0 : i32
    %c0_i32_1 = arith.constant 0 : i32
    return %c0_i32, %c0_i32_0 : i32, i32
  }
  func.func @transform_4(%arg0: i32) -> (i32, i32) {
    %c0_i32 = arith.constant 0 : i32
    %c0_i32_0 = arith.constant 0 : i32
    %c0_i32_1 = arith.constant 0 : i32
    return %c0_i32, %c0_i32_0 : i32, i32
  }
  func.func @transform_5(%arg0: i32) -> (i32, i32) {
    %c0_i32 = arith.constant 0 : i32
    %c0_i32_0 = arith.constant 0 : i32
    return %arg0, %c0_i32 : i32, i32
  }
}

</mosaic_0001>

<bundles_post_ra>
// kernel: tpu_custom_call.1
= control target key start
LH: loop header
LB: loop body
LE: loop exit
PB: predicated region body
PF: predicated region fallthrough
CT: control target
= control target key end

     0   :  { %v1454_v1 = vmov 0.0   ;;  %vm1455_vm0 = vmmov 0   ;;  %vm57_vm1 = vcmask 261120   ;;  %s2236_s0 = inlined_call_operand.vmem [shape: f32[200,32], index: 0, kind: input, shape index: {}]   ;;  %s2237_s1 = inlined_call_operand.vmem [shape: f32[32,64], index: 1, kind: input, shape index: {}]   ;;  %s2238_s2 = inlined_call_operand.vmem [shape: f32[1,64], index: 2, kind: input, shape index: {}]   ;;  %s2239_s3 = inlined_call_operand.vmem [shape: f32[64,128], index: 3, kind: input, shape index: {}]   ;;  %s2240_s4 = inlined_call_operand.vmem [shape: f32[1,128], index: 4, kind: input, shape index: {}]   ;;  %s2241_s5 = inlined_call_operand.hbm [shape: f32[200,128], index: 5, kind: output, shape index: {}]  }
   0x1   :  { %v49_v0 = vld [vmem:[%s2237_s1 + $0x18] sm:$0xff]  ;;  %1137 = vmatprep.subr.mxu0 %v1454_v1  ;;  %v48_v2 = vld [vmem:[%s2237_s1 + $0x10] sm:$0xff]  ;;  %1145 = vmatprep.mubr.msk.f32.mxu0 %vm1455_vm0, %v1454_v1  ;;  %v47_v3 = vld [vmem:[%s2237_s1 + $0x8] sm:$0xff] }
   0x2   :  { %1138 = vmatpush3.msra.mxu0 %v49_v0  ;;  %1311 = vmatprep.subr.mxu1 %v1454_v1  ;;  %v46_v4 = vld [vmem:[%s2237_s1] sm:$0xff]  ;;  %v355_v6 = vld [vmem:[%s2239_s3 + $0x38] sm:$0xff]  ;;  %v22_v7 = vld [vmem:[%s2236_s0 + $0x8] sm:$0xff] }
   0x3   :  { %1139 = vmatprep.subr.mxu0 %v1454_v1  ;;  %1239 = vmatprep.mubr.msk.f32.mxu1 %vm1455_vm0, %v1454_v1  ;;  %v21_v5 = vld [vmem:[%s2236_s0] sm:$0xff]  ;;  %v354_v8 = vld [vmem:[%s2239_s3 + $0x30] sm:$0xff]  ;;  %v353_v9 = vld [vmem:[%s2239_s3 + $0x28] sm:$0xff] }
   0x4   :  { %1140 = vmatpush3.msra.mxu0 %v48_v2  ;;  %1319 = vmatpush3.msra.mxu1 %v355_v6 }
   0x5   :  { %1141 = vmatprep.subr.mxu0 %v1454_v1 }
   0x6   :  { %1142 = vmatpush3.msra.mxu0 %v47_v3 }
   0x7   :  { %1143 = vmatprep.subr.mxu0 %v1454_v1 }
   0x8   :  { %1144 = vmatpush3.msra.mxu0 %v46_v4 }
   0x9   :  { %1146 = vmatmul.mubr.msk.f32.vlgmr.msra.gmra.mxu0 %vm57_vm1, %v21_v5  ;;  %1220 = vmatprep.subr.mxu0 %v1454_v1 }
   0xa   :  { %1148 = vmatprep.mubr.msk.f32.mxu0 %vm1455_vm0, %v1454_v1  ;;  %1221 = vmatpush3.msra.mxu0 %v355_v6 }
   0xb   :  { %1222 = vmatprep.subr.mxu0 %v1454_v1 }
   0xc   :  { %10 = vsyncpa [#allocation3], 0  ;;  %1223 = vmatpush3.msra.mxu0 %v354_v8  ;;  %1312 = vmatprep.subr.mxu1 %v1454_v1  ;;  %v352_v10 = vld [vmem:[%s2239_s3 + $0x20] sm:$0xff]  ;;  %v23_v11 = vld [vmem:[%s2236_s0 + $0x10] sm:$0xff]  ;;  %vm363_vm2 = vcmask 523264  }
   0xd   :  { %1149 = vmatmul.mubr.msk.f32.gmra.mxu0 %vm57_vm1, %v22_v7  ;;  %1224 = vmatprep.subr.mxu0 %v1454_v1  ;;  %v351_v12 = vld [vmem:[%s2239_s3 + $0x18] sm:$0xff]  ;;  %v25_v14 = vld [vmem:[%s2236_s0 + $0x20] sm:$0xff]  ;;  %v26_v15 = vld [vmem:[%s2236_s0 + $0x28] sm:$0xff] }
   0xe   :  { %1151 = vmatprep.mubr.msk.f32.mxu0 %vm1455_vm0, %v1454_v1  ;;  %1225 = vmatpush3.msra.mxu0 %v353_v9  ;;  %v24_v13 = vld [vmem:[%s2236_s0 + $0x18] sm:$0xff]  ;;  %v27_v16 = vld [vmem:[%s2236_s0 + $0x30] sm:$0xff]  ;;  %v29_v18 = vld [vmem:[%s2236_s0 + $0x40] sm:$0xff] }
   0xf   :  { %1226 = vmatprep.subr.mxu0 %v1454_v1  ;;  %1320 = vmatpush3.msra.mxu1 %v354_v8  ;;  %v28_v17 = vld [vmem:[%s2236_s0 + $0x38] sm:$0xff]  ;;  %v30_v19 = vld [vmem:[%s2236_s0 + $0x48] sm:$0xff]  ;;  %v31_v20 = vld [vmem:[%s2236_s0 + $0x50] sm:$0xff] }
  0x10   :  { %1227 = vmatpush3.msra.mxu0 %v352_v10  ;;  %1313 = vmatprep.subr.mxu1 %v1454_v1  ;;  %v32_v21 = vld [vmem:[%s2236_s0 + $0x58] sm:$0xff]  ;;  %v33_v22 = vld [vmem:[%s2236_s0 + $0x60] sm:$0xff]  ;;  %v34_v23 = vld [vmem:[%s2236_s0 + $0x68] sm:$0xff] }
  0x11   :  { %1152 = vmatmul.mubr.msk.f32.gmra.mxu0 %vm57_vm1, %v23_v11  ;;  %1228 = vmatprep.subr.mxu0 %v1454_v1  ;;  %v35_v24 = vld [vmem:[%s2236_s0 + $0x70] sm:$0xff]  ;;  %v36_v25 = vld [vmem:[%s2236_s0 + $0x78] sm:$0xff]  ;;  %v37_v26 = vld [vmem:[%s2236_s0 + $0x80] sm:$0xff] }
  0x12   :  { %1154 = vmatprep.mubr.msk.f32.mxu0 %vm1455_vm0, %v1454_v1  ;;  %1321 = vmatpush3.msra.mxu1 %v353_v9  ;;  %v350_v27 = vld [vmem:[%s2239_s3 + $0x10] sm:$0xff]  ;;  %v38_v28 = vld [vmem:[%s2236_s0 + $0x88] sm:$0xff]  ;;  %v348_v30 = vld [vmem:[%s2239_s3] sm:$0xff] }
  0x13   :  { %1229 = vmatpush3.msra.mxu0 %v351_v12  ;;  %1314 = vmatprep.subr.mxu1 %v1454_v1  ;;  %v349_v29 = vld [vmem:[%s2239_s3 + $0x8] sm:$0xff]  ;;  %v39_v31 = vld [vmem:[%s2236_s0 + $0x90] sm:$0xff]  ;;  %v40_v32 = vld [vmem:[%s2236_s0 + $0x98] sm:$0xff] }
  0x14   :  { %1230 = vmatprep.subr.mxu0 %v1454_v1  ;;  %1322 = vmatpush3.msra.mxu1 %v352_v10  ;;  %v41_v33 = vld [vmem:[%s2236_s0 + $0xa0] sm:$0xff]  ;;  %v42_v34 = vld [vmem:[%s2236_s0 + $0xa8] sm:$0xff]  ;;  %v43_v35 = vld [vmem:[%s2236_s0 + $0xb0] sm:$0xff] }
  0x15   :  { %1155 = vmatmul.mubr.msk.f32.gmra.mxu0 %vm57_vm1, %v24_v13  ;;  %1315 = vmatprep.subr.mxu1 %v1454_v1  ;;  %v44_v36 = vld [vmem:[%s2236_s0 + $0xb8] sm:$0xff]  ;;  %v45_v37 = vld [vmem:[%s2236_s0 + $0xc0] sm:$0xff] }
  0x16   :  { %1157 = vmatprep.mubr.msk.f32.mxu0 %vm1455_vm0, %v1454_v1  ;;  %1323 = vmatpush3.msra.mxu1 %v351_v12  ;;  %v1702_v38 = vld [vmem:[%s2238_s2] ss:$0 sm:$0xff] }
  0x17   :  { %1316 = vmatprep.subr.mxu1 %v1454_v1  ;;  %1231 = vmatpush3.msra.mxu0 %v350_v27 }
  0x18   :  { %1324 = vmatpush3.msra.mxu1 %v350_v27  ;;  %1232 = vmatprep.subr.mxu0 %v1454_v1 }
  0x19   :  { %1158 = vmatmul.mubr.msk.f32.gmra.mxu0 %vm57_vm1, %v25_v14  ;;  %1317 = vmatprep.subr.mxu1 %v1454_v1 }
  0x1a   :  { %1160 = vmatprep.mubr.msk.f32.mxu0 %vm1455_vm0, %v1454_v1  ;;  %1233 = vmatpush3.msra.mxu0 %v349_v29 }
  0x1b   :  { %1325 = vmatpush3.msra.mxu1 %v349_v29  ;;  %1234 = vmatprep.subr.mxu0 %v1454_v1 }
  0x1c   :  { %1235 = vmatpush3.msra.mxu0 %v348_v30  ;;  %1318 = vmatprep.subr.mxu1 %v1454_v1 }
  0x1d   :  { %1161 = vmatmul.mubr.msk.f32.gmra.mxu0 %vm57_vm1, %v26_v15  ;;  %1326 = vmatpush3.msra.mxu1 %v348_v30 }
  0x1e   :  { %1163 = vmatprep.mubr.msk.f32.mxu0 %vm1455_vm0, %v1454_v1 }
  0x21   :  { %1164 = vmatmul.mubr.msk.f32.gmra.mxu0 %vm57_vm1, %v27_v16 }
  0x22   :  { %1166 = vmatprep.mubr.msk.f32.mxu0 %vm1455_vm0, %v1454_v1 }
  0x25   :  { %1167 = vmatmul.mubr.msk.f32.gmra.mxu0 %vm57_vm1, %v28_v17 }
  0x26   :  { %1169 = vmatprep.mubr.msk.f32.mxu0 %vm1455_vm0, %v1454_v1 }
  0x29   :  { %1170 = vmatmul.mubr.msk.f32.gmra.mxu0 %vm57_vm1, %v29_v18 }
  0x2a   :  { %1172 = vmatprep.mubr.msk.f32.mxu0 %vm1455_vm0, %v1454_v1 }
  0x2d   :  { %1173 = vmatmul.mubr.msk.f32.gmra.mxu0 %vm57_vm1, %v30_v19 }
  0x2e   :  { %1175 = vmatprep.mubr.msk.f32.mxu0 %vm1455_vm0, %v1454_v1 }
  0x31   :  { %1176 = vmatmul.mubr.msk.f32.gmra.mxu0 %vm57_vm1, %v31_v20 }
  0x32   :  { %1178 = vmatprep.mubr.msk.f32.mxu0 %vm1455_vm0, %v1454_v1 }
  0x35   :  { %1179 = vmatmul.mubr.msk.f32.gmra.mxu0 %vm57_vm1, %v32_v21 }
  0x36   :  { %1181 = vmatprep.mubr.msk.f32.mxu0 %vm1455_vm0, %v1454_v1 }
  0x39   :  { %1182 = vmatmul.mubr.msk.f32.gmra.mxu0 %vm57_vm1, %v33_v22 }
  0x3a   :  { %1184 = vmatprep.mubr.msk.f32.mxu0 %vm1455_vm0, %v1454_v1 }
  0x3d   :  { %1185 = vmatmul.mubr.msk.f32.gmra.mxu0 %vm57_vm1, %v34_v23 }
  0x3e   :  { %1187 = vmatprep.mubr.msk.f32.mxu0 %vm1455_vm0, %v1454_v1 }
  0x41   :  { %1188 = vmatmul.mubr.msk.f32.gmra.mxu0 %vm57_vm1, %v35_v24 }
  0x42   :  { %1190 = vmatprep.mubr.msk.f32.mxu0 %vm1455_vm0, %v1454_v1 }
  0x45   :  { %1191 = vmatmul.mubr.msk.f32.gmra.mxu0 %vm57_vm1, %v36_v25 }
  0x46   :  { %1193 = vmatprep.mubr.msk.f32.mxu0 %vm1455_vm0, %v1454_v1 }
  0x49   :  { %1194 = vmatmul.mubr.msk.f32.gmra.mxu0 %vm57_vm1, %v37_v26 }
  0x4a   :  { %1196 = vmatprep.mubr.msk.f32.mxu0 %vm1455_vm0, %v1454_v1 }
  0x4d   :  { %1197 = vmatmul.mubr.msk.f32.gmra.mxu0 %vm57_vm1, %v38_v28 }
  0x4e   :  { %1199 = vmatprep.mubr.msk.f32.mxu0 %vm1455_vm0, %v1454_v1 }
  0x51   :  { %1200 = vmatmul.mubr.msk.f32.gmra.mxu0 %vm57_vm1, %v39_v31 }
  0x52   :  { %1202 = vmatprep.mubr.msk.f32.mxu0 %vm1455_vm0, %v1454_v1 }
  0x55   :  { %1203 = vmatmul.mubr.msk.f32.gmra.mxu0 %vm57_vm1, %v40_v32 }
  0x56   :  { %1205 = vmatprep.mubr.msk.f32.mxu0 %vm1455_vm0, %v1454_v1 }
  0x59   :  { %1206 = vmatmul.mubr.msk.f32.gmra.mxu0 %vm57_vm1, %v41_v33 }
  0x5a   :  { %1208 = vmatprep.mubr.msk.f32.mxu0 %vm1455_vm0, %v1454_v1 }
  0x5d   :  { %1209 = vmatmul.mubr.msk.f32.gmra.mxu0 %vm57_vm1, %v42_v34 }
  0x5e   :  { %1211 = vmatprep.mubr.msk.f32.mxu0 %vm1455_vm0, %v1454_v1 }
  0x61   :  { %1212 = vmatmul.mubr.msk.f32.gmra.mxu0 %vm57_vm1, %v43_v35 }
  0x62   :  { %1214 = vmatprep.mubr.msk.f32.mxu0 %vm1455_vm0, %v1454_v1 }
  0x65   :  { %1215 = vmatmul.mubr.msk.f32.gmra.mxu0 %vm57_vm1, %v44_v36 }
  0x66   :  { %1217 = vmatprep.mubr.msk.f32.mxu0 %vm1455_vm0, %v1454_v1 }
  0x69   :  { %1218 = vmatmul.mubr.msk.f32.gmra.mxu0 %vm57_vm1, %v45_v37 }
  0x6a   :  { %1236 = vmatprep.mubr.msk.f32.mxu0 %vm1455_vm0, %v1454_v1 }
  0xc9   :  { %v199_v39 = vpop.f32.mrf.mxu0 }
  0xca   :  { %v200_v40 = vadd.f32 %v1702_v38, %v199_v39 }
  0xcb   :  { %v1147_v41 = vpop.f32.mrf.mxu0 }
  0xcc   :  { %v323_v42 = vmax.f32 %v200_v40, 0.0 }
  0xcd   :  { %v204_v43 = vpop.f32.mrf.mxu0 }
  0xce   :  { %v205_v44 = vadd.f32 %v1702_v38, %v204_v43  ;;  %1237 = vmatmul.mubr.msk.f32.vlgmr.msra.gmra.mxu0 %vm363_vm2, %v323_v42 }
  0xcf   :  { %v1150_v45 = vpop.f32.mrf.mxu0 }
  0xd0   :  { %v324_v46 = vmax.f32 %v205_v44, 0.0 }
  0xd1   :  { %v209_v47 = vpop.f32.mrf.mxu0 }
  0xd2   :  { %v210_v48 = vadd.f32 %v1702_v38, %v209_v47  ;;  %1240 = vmatmul.mubr.msk.f32.vlgmr.msra.gmra.mxu1 %vm363_vm2, %v324_v46 }
  0xd3   :  { %v1153_v49 = vpop.f32.mrf.mxu0  ;;  %1242 = vmatprep.mubr.msk.f32.mxu1 %vm1455_vm0, %v1454_v1 }
  0xd4   :  { %v325_v50 = vmax.f32 %v210_v48, 0.0 }
  0xd5   :  { %v214_v51 = vpop.f32.mrf.mxu0 }
  0xd6   :  { %v215_v52 = vadd.f32 %v1702_v38, %v214_v51  ;;  %1243 = vmatmul.mubr.msk.f32.gmra.mxu1 %vm363_vm2, %v325_v50 }
  0xd7   :  { %v1156_v53 = vpop.f32.mrf.mxu0  ;;  %1245 = vmatprep.mubr.msk.f32.mxu1 %vm1455_vm0, %v1454_v1 }
  0xd8   :  { %v326_v54 = vmax.f32 %v215_v52, 0.0 }
  0xd9   :  { %v219_v55 = vpop.f32.mrf.mxu0 }
  0xda   :  { %v220_v56 = vadd.f32 %v1702_v38, %v219_v55  ;;  %1246 = vmatmul.mubr.msk.f32.gmra.mxu1 %vm363_vm2, %v326_v54 }
  0xdb   :  { %v1159_v57 = vpop.f32.mrf.mxu0  ;;  %1248 = vmatprep.mubr.msk.f32.mxu1 %vm1455_vm0, %v1454_v1 }
  0xdc   :  { %v327_v58 = vmax.f32 %v220_v56, 0.0 }
  0xdd   :  { %v224_v59 = vpop.f32.mrf.mxu0 }
  0xde   :  { %v225_v60 = vadd.f32 %v1702_v38, %v224_v59  ;;  %1249 = vmatmul.mubr.msk.f32.gmra.mxu1 %vm363_vm2, %v327_v58 }
  0xdf   :  { %v1162_v61 = vpop.f32.mrf.mxu0  ;;  %1251 = vmatprep.mubr.msk.f32.mxu1 %vm1455_vm0, %v1454_v1 }
  0xe0   :  { %v328_v62 = vmax.f32 %v225_v60, 0.0 }
  0xe1   :  { %v229_v63 = vpop.f32.mrf.mxu0 }
  0xe2   :  { %v230_v0 = vadd.f32 %v1702_v38, %v229_v63  ;;  %1252 = vmatmul.mubr.msk.f32.gmra.mxu1 %vm363_vm2, %v328_v62 }
  0xe3   :  { %v1165_v2 = vpop.f32.mrf.mxu0  ;;  %1254 = vmatprep.mubr.msk.f32.mxu1 %vm1455_vm0, %v1454_v1 }
  0xe4   :  { %v329_v3 = vmax.f32 %v230_v0, 0.0 }
  0xe5   :  { %v234_v4 = vpop.f32.mrf.mxu0 }
  0xe6   :  { %v235_v5 = vadd.f32 %v1702_v38, %v234_v4  ;;  %1255 = vmatmul.mubr.msk.f32.gmra.mxu1 %vm363_vm2, %v329_v3 }
  0xe7   :  { %v1168_v6 = vpop.f32.mrf.mxu0  ;;  %1257 = vmatprep.mubr.msk.f32.mxu1 %vm1455_vm0, %v1454_v1 }
  0xe8   :  { %v330_v7 = vmax.f32 %v235_v5, 0.0 }
  0xe9   :  { %v239_v8 = vpop.f32.mrf.mxu0 }
  0xea   :  { %v240_v9 = vadd.f32 %v1702_v38, %v239_v8  ;;  %1258 = vmatmul.mubr.msk.f32.gmra.mxu1 %vm363_vm2, %v330_v7 }
  0xeb   :  { %v1171_v10 = vpop.f32.mrf.mxu0  ;;  %1260 = vmatprep.mubr.msk.f32.mxu1 %vm1455_vm0, %v1454_v1 }
  0xec   :  { %v331_v11 = vmax.f32 %v240_v9, 0.0 }
  0xed   :  { %v244_v12 = vpop.f32.mrf.mxu0 }
  0xee   :  { %v245_v13 = vadd.f32 %v1702_v38, %v244_v12  ;;  %1261 = vmatmul.mubr.msk.f32.gmra.mxu1 %vm363_vm2, %v331_v11 }
  0xef   :  { %v1174_v14 = vpop.f32.mrf.mxu0  ;;  %1263 = vmatprep.mubr.msk.f32.mxu1 %vm1455_vm0, %v1454_v1 }
  0xf0   :  { %v332_v15 = vmax.f32 %v245_v13, 0.0  ;;  %v629_v14 = vlaneseq }
  0xf1   :  { %v249_v16 = vpop.f32.mrf.mxu0 }
  0xf2   :  { %v250_v17 = vadd.f32 %v1702_v38, %v249_v16  ;;  %1264 = vmatmul.mubr.msk.f32.gmra.mxu1 %vm363_vm2, %v332_v15  ;;  %v1800_v15 = vand.u32 127, %v629_v14  ;;  %v1805_v16 = vld [vmem:[%s2240_s4] ss:$0 sm:$0xff]  ;;  %s1456_s4 = smov [#allocation2]  }
  0xf3   :  { %v1177_v18 = vpop.f32.mrf.mxu0  ;;  %1266 = vmatprep.mubr.msk.f32.mxu1 %vm1455_vm0, %v1454_v1  ;;  %s1012_s15 = sshll.u32 %s1456_s4, 4  ;;  %s1013_s15 = int_to_ptr.vmem [resolvable:$true] %s1012_s15 }
  0xf4   :  { %v333_v19 = vmax.f32 %v250_v17, 0.0  ;;  %vm631_vm3 = vcmp.lt.s32.totalorder %v1800_v15, 8  ;;  %s1432_s16 = scalar_lea.vmem %s1013_s15, 3200  ;;  %p1437_p1 = scmp.lt.s32.totalorder %s1013_s15, %s1013_s15 }
  0xf5   :  { %v254_v20 = vpop.f32.mrf.mxu0  ;;  %p1433_p0 = scmp.ne.s32.totalorder %s1013_s15, %s1432_s16  ;;  %p1438_p2 = scmp.lt.s32.totalorder %s1432_s16, %s1432_s16 }
  0xf6   :  { %v255_v21 = vadd.f32 %v1702_v38, %v254_v20  ;;  %1267 = vmatmul.mubr.msk.f32.gmra.mxu1 %vm363_vm2, %v333_v19 }
  0xf7   :  { %v1180_v22 = vpop.f32.mrf.mxu0  ;;  %1269 = vmatprep.mubr.msk.f32.mxu1 %vm1455_vm0, %v1454_v1  ;;  %p1439_p3 = por %p1438_p2, %p1437_p1 }
  0xf8   :  { %v334_v23 = vmax.f32 %v255_v21, 0.0 }
  0xf9   :  { %v259_v24 = vpop.f32.mrf.mxu0  ;;  %p1440_p4 = pnand %p1439_p3, %p1433_p0 }
  0xfa   :  { %v260_v25 = vadd.f32 %v1702_v38, %v259_v24  ;;  %1270 = vmatmul.mubr.msk.f32.gmra.mxu1 %vm363_vm2, %v334_v23 }
  0xfb   :  { %v1183_v26 = vpop.f32.mrf.mxu0  ;;  %1272 = vmatprep.mubr.msk.f32.mxu1 %vm1455_vm0, %v1454_v1 }
  0xfc   :  { %v335_v27 = vmax.f32 %v260_v25, 0.0 }
  0xfd   :  { %v264_v28 = vpop.f32.mrf.mxu0 }
  0xfe   :  { %v265_v29 = vadd.f32 %v1702_v38, %v264_v28  ;;  %1273 = vmatmul.mubr.msk.f32.gmra.mxu1 %vm363_vm2, %v335_v27 }
  0xff   :  { %v1186_v30 = vpop.f32.mrf.mxu0  ;;  %1275 = vmatprep.mubr.msk.f32.mxu1 %vm1455_vm0, %v1454_v1 }
 0x100   :  { %v336_v31 = vmax.f32 %v265_v29, 0.0 }
 0x101   :  { %v269_v32 = vpop.f32.mrf.mxu0 }
 0x102   :  { %v270_v33 = vadd.f32 %v1702_v38, %v269_v32  ;;  %1276 = vmatmul.mubr.msk.f32.gmra.mxu1 %vm363_vm2, %v336_v31 }
 0x103   :  { %v1189_v34 = vpop.f32.mrf.mxu0  ;;  %1278 = vmatprep.mubr.msk.f32.mxu1 %vm1455_vm0, %v1454_v1 }
 0x104   :  { %v337_v35 = vmax.f32 %v270_v33, 0.0 }
 0x105   :  { %v274_v36 = vpop.f32.mrf.mxu0 }
 0x106   :  { %v275_v37 = vadd.f32 %v1702_v38, %v274_v36  ;;  %1279 = vmatmul.mubr.msk.f32.gmra.mxu1 %vm363_vm2, %v337_v35 }
 0x107   :  { %v1192_v39 = vpop.f32.mrf.mxu0  ;;  %1281 = vmatprep.mubr.msk.f32.mxu1 %vm1455_vm0, %v1454_v1 }
 0x108   :  { %v338_v40 = vmax.f32 %v275_v37, 0.0 }
 0x109   :  { %v279_v41 = vpop.f32.mrf.mxu0 }
 0x10a   :  { %v280_v42 = vadd.f32 %v1702_v38, %v279_v41  ;;  %1282 = vmatmul.mubr.msk.f32.gmra.mxu1 %vm363_vm2, %v338_v40 }
 0x10b   :  { %v1195_v43 = vpop.f32.mrf.mxu0  ;;  %1284 = vmatprep.mubr.msk.f32.mxu1 %vm1455_vm0, %v1454_v1 }
 0x10c   :  { %v339_v44 = vmax.f32 %v280_v42, 0.0 }
 0x10d   :  { %v284_v45 = vpop.f32.mrf.mxu0 }
 0x10e   :  { %v285_v46 = vadd.f32 %v1702_v38, %v284_v45  ;;  %1285 = vmatmul.mubr.msk.f32.gmra.mxu1 %vm363_vm2, %v339_v44 }
 0x10f   :  { %v1198_v47 = vpop.f32.mrf.mxu0  ;;  %1287 = vmatprep.mubr.msk.f32.mxu1 %vm1455_vm0, %v1454_v1 }
 0x110   :  { %v340_v48 = vmax.f32 %v285_v46, 0.0 }
 0x111   :  { %v289_v49 = vpop.f32.mrf.mxu0 }
 0x112   :  { %v290_v50 = vadd.f32 %v1702_v38, %v289_v49  ;;  %1288 = vmatmul.mubr.msk.f32.gmra.mxu1 %vm363_vm2, %v340_v48 }
 0x113   :  { %v1201_v51 = vpop.f32.mrf.mxu0  ;;  %1290 = vmatprep.mubr.msk.f32.mxu1 %vm1455_vm0, %v1454_v1 }
 0x114   :  { %v341_v52 = vmax.f32 %v290_v50, 0.0 }
 0x115   :  { %v294_v53 = vpop.f32.mrf.mxu0 }
 0x116   :  { %v295_v54 = vadd.f32 %v1702_v38, %v294_v53  ;;  %1291 = vmatmul.mubr.msk.f32.gmra.mxu1 %vm363_vm2, %v341_v52 }
 0x117   :  { %v1204_v55 = vpop.f32.mrf.mxu0  ;;  %1293 = vmatprep.mubr.msk.f32.mxu1 %vm1455_vm0, %v1454_v1 }
 0x118   :  { %v342_v56 = vmax.f32 %v295_v54, 0.0 }
 0x119   :  { %v299_v57 = vpop.f32.mrf.mxu0 }
 0x11a   :  { %v300_v58 = vadd.f32 %v1702_v38, %v299_v57  ;;  %1294 = vmatmul.mubr.msk.f32.gmra.mxu1 %vm363_vm2, %v342_v56 }
 0x11b   :  { %v1207_v59 = vpop.f32.mrf.mxu0  ;;  %1296 = vmatprep.mubr.msk.f32.mxu1 %vm1455_vm0, %v1454_v1 }
 0x11c   :  { %v343_v60 = vmax.f32 %v300_v58, 0.0 }
 0x11d   :  { %v304_v61 = vpop.f32.mrf.mxu0 }
 0x11e   :  { %v305_v62 = vadd.f32 %v1702_v38, %v304_v61  ;;  %1297 = vmatmul.mubr.msk.f32.gmra.mxu1 %vm363_vm2, %v343_v60 }
 0x11f   :  { %v1210_v63 = vpop.f32.mrf.mxu0  ;;  %1299 = vmatprep.mubr.msk.f32.mxu1 %vm1455_vm0, %v1454_v1 }
 0x120   :  { %v344_v0 = vmax.f32 %v305_v62, 0.0 }
 0x121   :  { %v309_v2 = vpop.f32.mrf.mxu0 }
 0x122   :  { %v310_v3 = vadd.f32 %v1702_v38, %v309_v2  ;;  %1300 = vmatmul.mubr.msk.f32.gmra.mxu1 %vm363_vm2, %v344_v0 }
 0x123   :  { %v1213_v4 = vpop.f32.mrf.mxu0  ;;  %1302 = vmatprep.mubr.msk.f32.mxu1 %vm1455_vm0, %v1454_v1 }
 0x124   :  { %v345_v5 = vmax.f32 %v310_v3, 0.0 }
 0x125   :  { %v314_v6 = vpop.f32.mrf.mxu0 }
 0x126   :  { %v315_v7 = vadd.f32 %v1702_v38, %v314_v6  ;;  %1303 = vmatmul.mubr.msk.f32.gmra.mxu1 %vm363_vm2, %v345_v5 }
 0x127   :  { %v1216_v8 = vpop.f32.mrf.mxu0  ;;  %1305 = vmatprep.mubr.msk.f32.mxu1 %vm1455_vm0, %v1454_v1 }
 0x128   :  { %v346_v9 = vmax.f32 %v315_v7, 0.0 }
 0x129   :  { %v319_v10 = vpop.f32.mrf.mxu0 }
 0x12a   :  { %v320_v11 = vadd.f32 %v1702_v38, %v319_v10  ;;  %1306 = vmatmul.mubr.msk.f32.gmra.mxu1 %vm363_vm2, %v346_v9 }
 0x12b   :  { %v1219_v12 = vpop.f32.mrf.mxu0  ;;  %1308 = vmatprep.mubr.msk.f32.mxu1 %vm1455_vm0, %v1454_v1 }
 0x12c   :  { %v347_v13 = vmax.f32 %v320_v11, 0.0 }
 0x12e   :  { %1309 = vmatmul.mubr.msk.f32.gmra.mxu1 %vm363_vm2, %v347_v13 }
 0x18e   :  { %v505_v17 = vpop.f32.mrf.mxu0 }
 0x18f   :  { %v1809_v38 = vadd.f32 %v1805_v16, %v505_v17 }
 0x190   :  { %v1238_v18 = vpop.f32.mrf.mxu0 }
 0x191   :  { %v1814_v1 = vsel %vm631_vm3, %v1809_v38, -1e+30 }
 0x192   :  { %v510_v19 = vpop.f32.mrf.mxu1  ;;  %657 = vmax.xlane.f32.xlu0 %v1814_v1 }
 0x193   :  { %v1818_v20 = vadd.f32 %v1805_v16, %v510_v19 }
 0x194   :  { %v1241_v21 = vpop.f32.mrf.mxu1 }
 0x195   :  { %v1823_v22 = vsel %vm631_vm3, %v1818_v20, -1e+30 }
 0x196   :  { %v515_v23 = vpop.f32.mrf.mxu1  ;;  %659 = vmax.xlane.f32.xlu0 %v1823_v22 }
 0x197   :  { %v1827_v24 = vadd.f32 %v1805_v16, %v515_v23 }
 0x198   :  { %v1244_v25 = vpop.f32.mrf.mxu1 }
 0x199   :  { %v1832_v26 = vsel %vm631_vm3, %v1827_v24, -1e+30 }
 0x19a   :  { %661 = vmax.xlane.f32.xlu1 %v1832_v26  ;;  %v520_v27 = vpop.f32.mrf.mxu1 }
 0x19b   :  { %v1836_v28 = vadd.f32 %v1805_v16, %v520_v27 }
 0x19c   :  { %v1247_v29 = vpop.f32.mrf.mxu1 }
 0x19d   :  { %v1841_v30 = vsel %vm631_vm3, %v1836_v28, -1e+30 }
 0x19e   :  { %663 = vmax.xlane.f32.xlu1 %v1841_v30  ;;  %v525_v31 = vpop.f32.mrf.mxu1 }
 0x19f   :  { %v1845_v32 = vadd.f32 %v1805_v16, %v525_v31 }
 0x1a0   :  { %v1250_v33 = vpop.f32.mrf.mxu1 }
 0x1a1   :  { %v1850_v34 = vsel %vm631_vm3, %v1845_v32, -1e+30 }
 0x1a2   :  { %v530_v35 = vpop.f32.mrf.mxu1  ;;  %665 = vmax.xlane.f32.xlu0 %v1850_v34 }
 0x1a3   :  { %v1854_v36 = vadd.f32 %v1805_v16, %v530_v35 }
 0x1a4   :  { %v1253_v37 = vpop.f32.mrf.mxu1 }
 0x1a5   :  { %v1859_v39 = vsel %vm631_vm3, %v1854_v36, -1e+30 }
 0x1a6   :  { %667 = vmax.xlane.f32.xlu1 %v1859_v39  ;;  %v535_v40 = vpop.f32.mrf.mxu1 }
 0x1a7   :  { %v1863_v41 = vadd.f32 %v1805_v16, %v535_v40 }
 0x1a8   :  { %v1256_v42 = vpop.f32.mrf.mxu1 }
 0x1a9   :  { %v1868_v43 = vsel %vm631_vm3, %v1863_v41, -1e+30 }
 0x1aa   :  { %v540_v44 = vpop.f32.mrf.mxu1  ;;  %669 = vmax.xlane.f32.xlu0 %v1868_v43 }
 0x1ab   :  { %v1872_v45 = vadd.f32 %v1805_v16, %v540_v44 }
 0x1ac   :  { %v1259_v46 = vpop.f32.mrf.mxu1 }
 0x1ad   :  { %v1877_v47 = vsel %vm631_vm3, %v1872_v45, -1e+30 }
 0x1ae   :  { %671 = vmax.xlane.f32.xlu1 %v1877_v47  ;;  %v545_v48 = vpop.f32.mrf.mxu1 }
 0x1af   :  { %v1881_v49 = vadd.f32 %v1805_v16, %v545_v48 }
 0x1b0   :  { %v1262_v50 = vpop.f32.mrf.mxu1 }
 0x1b1   :  { %v1886_v51 = vsel %vm631_vm3, %v1881_v49, -1e+30 }
 0x1b2   :  { %v550_v52 = vpop.f32.mrf.mxu1  ;;  %673 = vmax.xlane.f32.xlu0 %v1886_v51 }
 0x1b3   :  { %v1890_v53 = vadd.f32 %v1805_v16, %v550_v52 }
 0x1b4   :  { %v1265_v54 = vpop.f32.mrf.mxu1 }
 0x1b5   :  { %v1895_v55 = vsel %vm631_vm3, %v1890_v53, -1e+30 }
 0x1b6   :  { %675 = vmax.xlane.f32.xlu1 %v1895_v55  ;;  %v555_v56 = vpop.f32.mrf.mxu1 }
 0x1b7   :  { %v1899_v57 = vadd.f32 %v1805_v16, %v555_v56 }
 0x1b8   :  { %v1268_v58 = vpop.f32.mrf.mxu1 }
 0x1b9   :  { %v1904_v59 = vsel %vm631_vm3, %v1899_v57, -1e+30 }
 0x1ba   :  { %v560_v60 = vpop.f32.mrf.mxu1  ;;  %677 = vmax.xlane.f32.xlu0 %v1904_v59 }
 0x1bb   :  { %v1908_v61 = vadd.f32 %v1805_v16, %v560_v60 }
 0x1bc   :  { %v1271_v62 = vpop.f32.mrf.mxu1 }
 0x1bd   :  { %v1913_v63 = vsel %vm631_vm3, %v1908_v61, -1e+30 }
 0x1be   :  { %679 = vmax.xlane.f32.xlu1 %v1913_v63  ;;  %v565_v0 = vpop.f32.mrf.mxu1 }
 0x1bf   :  { %v1917_v2 = vadd.f32 %v1805_v16, %v565_v0 }
 0x1c0   :  { %v1274_v3 = vpop.f32.mrf.mxu1 }
 0x1c1   :  { %v1922_v4 = vsel %vm631_vm3, %v1917_v2, -1e+30 }
 0x1c2   :  { %v570_v5 = vpop.f32.mrf.mxu1  ;;  %681 = vmax.xlane.f32.xlu0 %v1922_v4 }
 0x1c3   :  { %v1926_v6 = vadd.f32 %v1805_v16, %v570_v5 }
 0x1c4   :  { %v1277_v7 = vpop.f32.mrf.mxu1 }
 0x1c5   :  { %v1931_v8 = vsel %vm631_vm3, %v1926_v6, -1e+30 }
 0x1c6   :  { %683 = vmax.xlane.f32.xlu1 %v1931_v8  ;;  %v575_v9 = vpop.f32.mrf.mxu1 }
 0x1c7   :  { %v1935_v10 = vadd.f32 %v1805_v16, %v575_v9 }
 0x1c8   :  { %v1280_v11 = vpop.f32.mrf.mxu1 }
 0x1c9   :  { %v1940_v12 = vsel %vm631_vm3, %v1935_v10, -1e+30 }
 0x1ca   :  { %v580_v13 = vpop.f32.mrf.mxu1  ;;  %685 = vmax.xlane.f32.xlu0 %v1940_v12 }
 0x1cb   :  { %v1944_v14 = vadd.f32 %v1805_v16, %v580_v13 }
 0x1cc   :  { %v1283_v17 = vpop.f32.mrf.mxu1 }
 0x1cd   :  { %v1949_v18 = vsel %vm631_vm3, %v1944_v14, -1e+30 }
 0x1ce   :  { %687 = vmax.xlane.f32.xlu1 %v1949_v18  ;;  %v585_v19 = vpop.f32.mrf.mxu1 }
 0x1cf   :  { %v1953_v21 = vadd.f32 %v1805_v16, %v585_v19 }
 0x1d0   :  { %v1286_v23 = vpop.f32.mrf.mxu1 }
 0x1d1   :  { %v1958_v25 = vsel %vm631_vm3, %v1953_v21, -1e+30 }
 0x1d2   :  { %v590_v27 = vpop.f32.mrf.mxu1  ;;  %689 = vmax.xlane.f32.xlu0 %v1958_v25 }
 0x1d3   :  { %v1962_v29 = vadd.f32 %v1805_v16, %v590_v27 }
 0x1d4   :  { %v1289_v31 = vpop.f32.mrf.mxu1 }
 0x1d5   :  { %v1967_v33 = vsel %vm631_vm3, %v1962_v29, -1e+30 }
 0x1d6   :  { %691 = vmax.xlane.f32.xlu1 %v1967_v33  ;;  %v595_v35 = vpop.f32.mrf.mxu1 }
 0x1d7   :  { %v1971_v37 = vadd.f32 %v1805_v16, %v595_v35 }
 0x1d8   :  { %v1292_v40 = vpop.f32.mrf.mxu1 }
 0x1d9   :  { %v1976_v42 = vsel %vm631_vm3, %v1971_v37, -1e+30 }
 0x1da   :  { %v600_v44 = vpop.f32.mrf.mxu1  ;;  %693 = vmax.xlane.f32.xlu0 %v1976_v42 }
 0x1db   :  { %v1980_v46 = vadd.f32 %v1805_v16, %v600_v44 }
 0x1dc   :  { %v1295_v48 = vpop.f32.mrf.mxu1 }
 0x1dd   :  { %v1985_v50 = vsel %vm631_vm3, %v1980_v46, -1e+30 }
 0x1de   :  { %695 = vmax.xlane.f32.xlu1 %v1985_v50  ;;  %v605_v52 = vpop.f32.mrf.mxu1 }
 0x1df   :  { %v1989_v54 = vadd.f32 %v1805_v16, %v605_v52 }
 0x1e0   :  { %v1298_v56 = vpop.f32.mrf.mxu1 }
 0x1e1   :  { %v1994_v58 = vsel %vm631_vm3, %v1989_v54, -1e+30 }
 0x1e2   :  { %v610_v60 = vpop.f32.mrf.mxu1  ;;  %697 = vmax.xlane.f32.xlu0 %v1994_v58 }
 0x1e3   :  { %v1998_v62 = vadd.f32 %v1805_v16, %v610_v60 }
 0x1e4   :  { %v1301_v0 = vpop.f32.mrf.mxu1 }
 0x1e5   :  { %v2003_v3 = vsel %vm631_vm3, %v1998_v62, -1e+30 }
 0x1e6   :  { %699 = vmax.xlane.f32.xlu1 %v2003_v3  ;;  %v615_v5 = vpop.f32.mrf.mxu1 }
 0x1e7   :  { %v2007_v7 = vadd.f32 %v1805_v16, %v615_v5 }
 0x1e8   :  { %v1304_v9 = vpop.f32.mrf.mxu1 }
 0x1e9   :  { %2248 = vst [vmem:[#allocation5_spill] sm:$0xff] %v2007_v7  ;;  %v2012_v11 = vsel %vm631_vm3, %v2007_v7, -1e+30 }
 0x1ea   :  { %v620_v13 = vpop.f32.mrf.mxu1  ;;  %701 = vmax.xlane.f32.xlu0 %v2012_v11 }
 0x1eb   :  { %v2016_v17 = vadd.f32 %v1805_v16, %v620_v13 }
 0x1ec   :  { %v1307_v19 = vpop.f32.mrf.mxu1 }
 0x1ed   :  { %2249 = vst [vmem:[#allocation6_spill] sm:$0xff] %v2016_v17  ;;  %v2021_v23 = vsel %vm631_vm3, %v2016_v17, -1e+30 }
 0x1ee   :  { %703 = vmax.xlane.f32.xlu1 %v2021_v23  ;;  %v625_v27 = vpop.f32.mrf.mxu1 }
 0x1ef   :  { %v2025_v31 = vadd.f32 %v1805_v16, %v625_v27 }
 0x1f0   :  { %v1310_v35 = vpop.f32.mrf.mxu1 }
 0x1f1   :  { %2250 = vst [vmem:[#allocation7_spill] sm:$0xff] %v2025_v31  ;;  %v2030_v40 = vsel %vm631_vm3, %v2025_v31, -1e+30 }
 0x1f2   :  { %705 = vmax.xlane.f32.xlu0 %v2030_v40 }
 0x21b   :  { %v658_v44 = vpop.xlane.xlu0 %657 }
 0x21c   :  { %v707_v48 = vsub.f32 %v1814_v1, %v658_v44 }
 0x21e   :  { %v732_v52 = vmul.f32 1.442695, %v707_v48 }
 0x21f   :  { %v660_v56 = vpop.xlane.xlu0 %659 }
 0x220   :  { %1332 = vpow2.f32 %v732_v52  ;;  %v708_v60 = vsub.f32 %v1823_v22, %v660_v56 }
 0x222   :  { %v734_v0 = vmul.f32 1.442695, %v708_v60 }
 0x223   :  { %v662_v5 = vpop.xlane.xlu1 %661 }
 0x224   :  { %1334 = vpow2.f32 %v734_v0  ;;  %v709_v16 = vsub.f32 %v1832_v26, %v662_v5 }
 0x226   :  { %v736_v9 = vmul.f32 1.442695, %v709_v16 }
 0x227   :  { %v664_v13 = vpop.xlane.xlu1 %663 }
 0x228   :  { %1336 = vpow2.f32 %v736_v9  ;;  %v710_v19 = vsub.f32 %v1841_v30, %v664_v13 }
 0x22a   :  { %v738_v27 = vmul.f32 1.442695, %v710_v19 }
 0x22b   :  { %v666_v35 = vpop.xlane.xlu0 %665 }
 0x22c   :  { %1338 = vpow2.f32 %v738_v27  ;;  %v711_v1 = vsub.f32 %v1850_v34, %v666_v35 }
 0x22d   :  { %v2038_v44 = vpop.eup %1332 }
 0x22e   :  { %v740_v48 = vmul.f32 1.442695, %v711_v1  ;;  %782 = vadd.xlane.f32.xlu1 %v2038_v44 }
 0x22f   :  { %v668_v22 = vpop.xlane.xlu1 %667 }
 0x230   :  { %1340 = vpow2.f32 %v740_v48  ;;  %v712_v52 = vsub.f32 %v1859_v39, %v668_v22 }
 0x231   :  { %v2042_v26 = vpop.eup %1334 }
 0x232   :  { %v742_v56 = vmul.f32 1.442695, %v712_v52  ;;  %784 = vadd.xlane.f32.xlu0 %v2042_v26 }
 0x233   :  { %v670_v30 = vpop.xlane.xlu0 %669 }
 0x234   :  { %1342 = vpow2.f32 %v742_v56  ;;  %v713_v60 = vsub.f32 %v1868_v43, %v670_v30 }
 0x235   :  { %v2046_v0 = vpop.eup %1336 }
 0x236   :  { %v744_v34 = vmul.f32 1.442695, %v713_v60  ;;  %786 = vadd.xlane.f32.xlu1 %v2046_v0 }
 0x237   :  { %v672_v5 = vpop.xlane.xlu1 %671 }
 0x238   :  { %1344 = vpow2.f32 %v744_v34  ;;  %v714_v16 = vsub.f32 %v1877_v47, %v672_v5 }
 0x239   :  { %v2050_v9 = vpop.eup %1338 }
 0x23a   :  { %v746_v39 = vmul.f32 1.442695, %v714_v16  ;;  %788 = vadd.xlane.f32.xlu0 %v2050_v9 }
 0x23b   :  { %v674_v13 = vpop.xlane.xlu0 %673 }
 0x23c   :  { %1346 = vpow2.f32 %v746_v39  ;;  %v715_v19 = vsub.f32 %v1886_v51, %v674_v13 }
 0x23d   :  { %v2054_v27 = vpop.eup %1340 }
 0x23e   :  { %v748_v43 = vmul.f32 1.442695, %v715_v19  ;;  %790 = vadd.xlane.f32.xlu1 %v2054_v27 }
 0x23f   :  { %v676_v35 = vpop.xlane.xlu1 %675 }
 0x240   :  { %1348 = vpow2.f32 %v748_v43  ;;  %v716_v1 = vsub.f32 %v1895_v55, %v676_v35 }
 0x241   :  { %v2058_v48 = vpop.eup %1342 }
 0x242   :  { %v750_v47 = vmul.f32 1.442695, %v716_v1  ;;  %792 = vadd.xlane.f32.xlu0 %v2058_v48 }
 0x243   :  { %v678_v22 = vpop.xlane.xlu0 %677 }
 0x244   :  { %1350 = vpow2.f32 %v750_v47  ;;  %v717_v52 = vsub.f32 %v1904_v59, %v678_v22 }
 0x245   :  { %v2062_v56 = vpop.eup %1344 }
 0x246   :  { %v752_v51 = vmul.f32 1.442695, %v717_v52  ;;  %794 = vadd.xlane.f32.xlu1 %v2062_v56 }
 0x247   :  { %v680_v30 = vpop.xlane.xlu1 %679 }
 0x248   :  { %1352 = vpow2.f32 %v752_v51  ;;  %v718_v60 = vsub.f32 %v1913_v63, %v680_v30 }
 0x249   :  { %v2066_v34 = vpop.eup %1346 }
 0x24a   :  { %v754_v55 = vmul.f32 1.442695, %v718_v60  ;;  %796 = vadd.xlane.f32.xlu0 %v2066_v34 }
 0x24b   :  { %v682_v5 = vpop.xlane.xlu0 %681 }
 0x24c   :  { %1354 = vpow2.f32 %v754_v55  ;;  %v719_v16 = vsub.f32 %v1922_v4, %v682_v5 }
 0x24d   :  { %v2070_v39 = vpop.eup %1348 }
 0x24e   :  { %v756_v59 = vmul.f32 1.442695, %v719_v16  ;;  %798 = vadd.xlane.f32.xlu1 %v2070_v39 }
 0x24f   :  { %v684_v13 = vpop.xlane.xlu1 %683 }
 0x250   :  { %1356 = vpow2.f32 %v756_v59  ;;  %v720_v19 = vsub.f32 %v1931_v8, %v684_v13 }
 0x251   :  { %v2074_v43 = vpop.eup %1350 }
 0x252   :  { %v758_v63 = vmul.f32 1.442695, %v720_v19  ;;  %800 = vadd.xlane.f32.xlu0 %v2074_v43 }
 0x253   :  { %v686_v35 = vpop.xlane.xlu0 %685 }
 0x254   :  { %1358 = vpow2.f32 %v758_v63  ;;  %v721_v1 = vsub.f32 %v1940_v12, %v686_v35 }
 0x255   :  { %v2078_v47 = vpop.eup %1352 }
 0x256   :  { %v760_v4 = vmul.f32 1.442695, %v721_v1  ;;  %802 = vadd.xlane.f32.xlu1 %v2078_v47 }
 0x257   :  { %v688_v22 = vpop.xlane.xlu1 %687 }
 0x258   :  { %1360 = vpow2.f32 %v760_v4  ;;  %v722_v52 = vsub.f32 %v1949_v18, %v688_v22 }
 0x259   :  { %v2082_v51 = vpop.eup %1354 }
 0x25a   :  { %v762_v8 = vmul.f32 1.442695, %v722_v52  ;;  %804 = vadd.xlane.f32.xlu0 %v2082_v51 }
 0x25b   :  { %v690_v30 = vpop.xlane.xlu0 %689 }
 0x25c   :  { %1362 = vpow2.f32 %v762_v8  ;;  %v723_v60 = vsub.f32 %v1958_v25, %v690_v30 }
 0x25d   :  { %v2086_v55 = vpop.eup %1356 }
 0x25e   :  { %v764_v12 = vmul.f32 1.442695, %v723_v60  ;;  %806 = vadd.xlane.f32.xlu1 %v2086_v55 }
 0x25f   :  { %v692_v5 = vpop.xlane.xlu1 %691 }
 0x260   :  { %1364 = vpow2.f32 %v764_v12  ;;  %v724_v16 = vsub.f32 %v1967_v33, %v692_v5 }
 0x261   :  { %v2090_v59 = vpop.eup %1358 }
 0x262   :  { %v766_v18 = vmul.f32 1.442695, %v724_v16  ;;  %808 = vadd.xlane.f32.xlu0 %v2090_v59 }
 0x263   :  { %v694_v13 = vpop.xlane.xlu0 %693 }
 0x264   :  { %1366 = vpow2.f32 %v766_v18  ;;  %v725_v19 = vsub.f32 %v1976_v42, %v694_v13 }
 0x265   :  { %v2094_v63 = vpop.eup %1360 }
 0x266   :  { %v768_v25 = vmul.f32 1.442695, %v725_v19  ;;  %810 = vadd.xlane.f32.xlu1 %v2094_v63 }
 0x267   :  { %v696_v35 = vpop.xlane.xlu1 %695 }
 0x268   :  { %1368 = vpow2.f32 %v768_v25  ;;  %v726_v1 = vsub.f32 %v1985_v50, %v696_v35 }
 0x269   :  { %v2098_v4 = vpop.eup %1362 }
 0x26a   :  { %v770_v33 = vmul.f32 1.442695, %v726_v1  ;;  %812 = vadd.xlane.f32.xlu0 %v2098_v4 }
 0x26b   :  { %v698_v22 = vpop.xlane.xlu0 %697 }
 0x26c   :  { %1370 = vpow2.f32 %v770_v33  ;;  %v727_v52 = vsub.f32 %v1994_v58, %v698_v22 }
 0x26d   :  { %v2102_v8 = vpop.eup %1364 }
 0x26e   :  { %v772_v42 = vmul.f32 1.442695, %v727_v52  ;;  %814 = vadd.xlane.f32.xlu1 %v2102_v8 }
 0x26f   :  { %v700_v30 = vpop.xlane.xlu1 %699 }
 0x270   :  { %1372 = vpow2.f32 %v772_v42  ;;  %v728_v60 = vsub.f32 %v2003_v3, %v700_v30 }
 0x271   :  { %v2106_v12 = vpop.eup %1366 }
 0x272   :  { %v774_v50 = vmul.f32 1.442695, %v728_v60  ;;  %816 = vadd.xlane.f32.xlu0 %v2106_v12 }
 0x273   :  { %v702_v5 = vpop.xlane.xlu0 %701 }
 0x274   :  { %1374 = vpow2.f32 %v774_v50  ;;  %v729_v16 = vsub.f32 %v2012_v11, %v702_v5 }
 0x275   :  { %v2110_v18 = vpop.eup %1368 }
 0x276   :  { %v776_v58 = vmul.f32 1.442695, %v729_v16  ;;  %818 = vadd.xlane.f32.xlu1 %v2110_v18 }
 0x277   :  { %v704_v13 = vpop.xlane.xlu1 %703 }
 0x278   :  { %1376 = vpow2.f32 %v776_v58  ;;  %v730_v19 = vsub.f32 %v2021_v23, %v704_v13 }
 0x279   :  { %v2114_v25 = vpop.eup %1370 }
 0x27a   :  { %v778_v3 = vmul.f32 1.442695, %v730_v19  ;;  %820 = vadd.xlane.f32.xlu0 %v2114_v25 }
 0x27b   :  { %v706_v35 = vpop.xlane.xlu0 %705 }
 0x27c   :  { %1378 = vpow2.f32 %v778_v3  ;;  %v731_v1 = vsub.f32 %v2030_v40, %v706_v35 }
 0x27d   :  { %v2118_v33 = vpop.eup %1372 }
 0x27e   :  { %v780_v11 = vmul.f32 1.442695, %v731_v1  ;;  %822 = vadd.xlane.f32.xlu1 %v2118_v33 }
 0x280   :  { %1380 = vpow2.f32 %v780_v11 }
 0x281   :  { %v2121_v22 = vpop.eup %1374 }
 0x282   :  { %824 = vadd.xlane.f32.xlu0 %v2121_v22 }
 0x285   :  { %v2124_v23 = vpop.eup %1376 }
 0x286   :  { %2251 = vst [vmem:[#allocation8_spill] sm:$0xff] %v2124_v23  ;;  %826 = vadd.xlane.f32.xlu1 %v2124_v23 }
 0x289   :  { %v2127_v52 = vpop.eup %1378 }
 0x28a   :  { %2252 = vst [vmem:[#allocation9_spill] sm:$0xff] %v2127_v52  ;;  %828 = vadd.xlane.f32.xlu0 %v2127_v52 }
 0x28d   :  { %v2130_v42 = vpop.eup %1380 }
 0x28e   :  { %2253 = vst [vmem:[#allocation10_spill] sm:$0xff] %v2130_v42  ;;  %830 = vadd.xlane.f32.xlu1 %v2130_v42 }
 0x2b7   :  { %v783_v40 = vpop.xlane.xlu1 %782 }
 0x2b8   :  { %1382 = vrcp.f32 %v783_v40 }
 0x2bb   :  { %v785_v30 = vpop.xlane.xlu0 %784 }
 0x2bc   :  { %1384 = vrcp.f32 %v785_v30 }
 0x2bf   :  { %v787_v60 = vpop.xlane.xlu1 %786 }
 0x2c0   :  { %1386 = vrcp.f32 %v787_v60 }
 0x2c3   :  { %v789_v50 = vpop.xlane.xlu0 %788 }
 0x2c4   :  { %1388 = vrcp.f32 %v789_v50 }
 0x2c5   :  { %v1383_v5 = vpop.eup %1382 }
 0x2c6   :  { %v857_v16 = vmul.f32 %v1383_v5, %v783_v40 }
 0x2c7   :  { %v791_v58 = vpop.xlane.xlu1 %790 }
 0x2c8   :  { %v882_v13 = vsub.f32 2.0, %v857_v16  ;;  %1390 = vrcp.f32 %v791_v58 }
 0x2c9   :  { %v1385_v19 = vpop.eup %1384 }
 0x2ca   :  { %v907_v3 = vmul.f32 %v1383_v5, %v882_v13  ;;  %v858_v35 = vmul.f32 %v1385_v19, %v785_v30 }
 0x2cb   :  { %v793_v1 = vpop.xlane.xlu0 %792 }
 0x2cc   :  { %v932_v11 = vmul.f32 %v2038_v44, %v907_v3  ;;  %v883_v31 = vsub.f32 2.0, %v858_v35  ;;  %1392 = vrcp.f32 %v793_v1 }
 0x2cd   :  { %v1387_v42 = vpop.eup %1386 }
 0x2ce   :  { %v957_v17 = vsel %vm631_vm3, %v932_v11, %v1809_v38  ;;  %v908_v52 = vmul.f32 %v1385_v19, %v883_v31  ;;  %v859_v7 = vmul.f32 %v1387_v42, %v787_v60 }
 0x2cf   :  { %982 = vst [vmem:[#allocation2] sm:$0xff] %v957_v17  ;;  %v795_v40 = vpop.xlane.xlu1 %794 }
 0x2d0   :  { %v933_v16 = vmul.f32 %v2042_v26, %v908_v52  ;;  %v884_v23 = vsub.f32 2.0, %v859_v7  ;;  %1394 = vrcp.f32 %v795_v40 }
 0x2d1   :  { %v1389_v5 = vpop.eup %1388 }
 0x2d2   :  { %v958_v44 = vsel %vm631_vm3, %v933_v16, %v1818_v20  ;;  %v909_v30 = vmul.f32 %v1387_v42, %v884_v23  ;;  %v860_v13 = vmul.f32 %v1389_v5, %v789_v50 }
 0x2d3   :  { %983 = vst [vmem:[#allocation2 + $0x8] sm:$0xff] %v958_v44  ;;  %v797_v3 = vpop.xlane.xlu0 %796 }
 0x2d4   :  { %v934_v35 = vmul.f32 %v2046_v0, %v909_v30  ;;  %v885_v38 = vsub.f32 2.0, %v860_v13  ;;  %1396 = vrcp.f32 %v797_v3 }
 0x2d5   :  { %v1391_v31 = vpop.eup %1390 }
 0x2d6   :  { %v959_v17 = vsel %vm631_vm3, %v934_v35, %v1827_v24  ;;  %v910_v7 = vmul.f32 %v1389_v5, %v885_v38  ;;  %v861_v26 = vmul.f32 %v1391_v31, %v791_v58 }
 0x2d7   :  { %984 = vst [vmem:[#allocation2 + $0x10] sm:$0xff] %v959_v17  ;;  %v799_v52 = vpop.xlane.xlu1 %798 }
 0x2d8   :  { %v935_v60 = vmul.f32 %v2050_v9, %v910_v7  ;;  %v886_v20 = vsub.f32 2.0, %v861_v26  ;;  %1398 = vrcp.f32 %v799_v52 }
 0x2d9   :  { %v1393_v23 = vpop.eup %1392 }
 0x2da   :  { %v960_v0 = vsel %vm631_vm3, %v935_v60, %v1836_v28  ;;  %v911_v42 = vmul.f32 %v1391_v31, %v886_v20  ;;  %v862_v50 = vmul.f32 %v1393_v23, %v793_v1 }
 0x2db   :  { %985 = vst [vmem:[#allocation2 + $0x18] sm:$0xff] %v960_v0  ;;  %v801_v19 = vpop.xlane.xlu0 %800 }
 0x2dc   :  { %v936_v11 = vmul.f32 %v2054_v27, %v911_v42  ;;  %v887_v24 = vsub.f32 2.0, %v862_v50  ;;  %1400 = vrcp.f32 %v801_v19 }
 0x2dd   :  { %v1395_v58 = vpop.eup %1394 }
 0x2de   :  { %v961_v9 = vsel %vm631_vm3, %v936_v11, %v1845_v32  ;;  %v912_v16 = vmul.f32 %v1393_v23, %v887_v24  ;;  %v863_v5 = vmul.f32 %v1395_v58, %v795_v40 }
 0x2df   :  { %986 = vst [vmem:[#allocation2 + $0x20] sm:$0xff] %v961_v9  ;;  %v803_v44 = vpop.xlane.xlu1 %802 }
 0x2e0   :  { %v937_v30 = vmul.f32 %v2058_v48, %v912_v16  ;;  %v888_v28 = vsub.f32 2.0, %v863_v5  ;;  %1402 = vrcp.f32 %v803_v44 }
 0x2e1   :  { %v1397_v1 = vpop.eup %1396 }
 0x2e2   :  { %v962_v27 = vsel %vm631_vm3, %v937_v30, %v1854_v36  ;;  %v913_v13 = vmul.f32 %v1395_v58, %v888_v28  ;;  %v864_v35 = vmul.f32 %v1397_v1, %v797_v3 }
 0x2e3   :  { %987 = vst [vmem:[#allocation2 + $0x28] sm:$0xff] %v962_v27  ;;  %v805_v38 = vpop.xlane.xlu0 %804 }
 0x2e4   :  { %v938_v31 = vmul.f32 %v2062_v56, %v913_v13  ;;  %v889_v32 = vsub.f32 2.0, %v864_v35  ;;  %1404 = vrcp.f32 %v805_v38 }
 0x2e5   :  { %v1399_v40 = vpop.eup %1398 }
 0x2e6   :  { %v963_v48 = vsel %vm631_vm3, %v938_v31, %v1863_v41  ;;  %v914_v17 = vmul.f32 %v1397_v1, %v889_v32  ;;  %v865_v7 = vmul.f32 %v1399_v40, %v799_v52 }
 0x2e7   :  { %988 = vst [vmem:[#allocation2 + $0x30] sm:$0xff] %v963_v48  ;;  %v807_v26 = vpop.xlane.xlu1 %806 }
 0x2e8   :  { %v939_v60 = vmul.f32 %v2066_v34, %v914_v17  ;;  %v890_v36 = vsub.f32 2.0, %v865_v7  ;;  %1406 = vrcp.f32 %v807_v26 }
 0x2e9   :  { %v1401_v3 = vpop.eup %1400 }
 0x2ea   :  { %v964_v56 = vsel %vm631_vm3, %v939_v60, %v1872_v45  ;;  %v915_v20 = vmul.f32 %v1399_v40, %v890_v36  ;;  %v866_v23 = vmul.f32 %v1401_v3, %v801_v19 }
 0x2eb   :  { %989 = vst [vmem:[#allocation2 + $0x38] sm:$0xff] %v964_v56  ;;  %v809_v0 = vpop.xlane.xlu0 %808 }
 0x2ec   :  { %v940_v42 = vmul.f32 %v2070_v39, %v915_v20  ;;  %v891_v41 = vsub.f32 2.0, %v866_v23  ;;  %1408 = vrcp.f32 %v809_v0 }
 0x2ed   :  { %v1403_v52 = vpop.eup %1402 }
 0x2ee   :  { %v965_v34 = vsel %vm631_vm3, %v940_v42, %v1881_v49  ;;  %v916_v50 = vmul.f32 %v1401_v3, %v891_v41  ;;  %v867_v11 = vmul.f32 %v1403_v52, %v803_v44 }
 0x2ef   :  { %990 = vst [vmem:[#allocation2 + $0x40] sm:$0xff] %v965_v34  ;;  %v811_v24 = vpop.xlane.xlu1 %810 }
 0x2f0   :  { %v941_v58 = vmul.f32 %v2074_v43, %v916_v50  ;;  %v892_v45 = vsub.f32 2.0, %v867_v11  ;;  %1410 = vrcp.f32 %v811_v24 }
 0x2f1   :  { %v1405_v19 = vpop.eup %1404 }
 0x2f2   :  { %v966_v39 = vsel %vm631_vm3, %v941_v58, %v1890_v53  ;;  %v917_v9 = vmul.f32 %v1403_v52, %v892_v45  ;;  %v868_v16 = vmul.f32 %v1405_v19, %v805_v38 }
 0x2f3   :  { %991 = vst [vmem:[#allocation2 + $0x48] sm:$0xff] %v966_v39  ;;  %v813_v5 = vpop.xlane.xlu0 %812 }
 0x2f4   :  { %v942_v30 = vmul.f32 %v2078_v47, %v917_v9  ;;  %v893_v49 = vsub.f32 2.0, %v868_v16  ;;  %1412 = vrcp.f32 %v813_v5 }
 0x2f5   :  { %v1407_v44 = vpop.eup %1406 }
 0x2f6   :  { %v967_v43 = vsel %vm631_vm3, %v942_v30, %v1899_v57  ;;  %v918_v28 = vmul.f32 %v1405_v19, %v893_v49  ;;  %v869_v1 = vmul.f32 %v1407_v44, %v807_v26 }
 0x2f7   :  { %992 = vst [vmem:[#allocation2 + $0x50] sm:$0xff] %v967_v43  ;;  %v815_v27 = vpop.xlane.xlu1 %814 }
 0x2f8   :  { %v943_v13 = vmul.f32 %v2082_v51, %v918_v28  ;;  %v894_v53 = vsub.f32 2.0, %v869_v1  ;;  %1414 = vrcp.f32 %v815_v27 }
 0x2f9   :  { %v1409_v35 = vpop.eup %1408 }
 0x2fa   :  { %v968_v47 = vsel %vm631_vm3, %v943_v13, %v1908_v61  ;;  %v919_v38 = vmul.f32 %v1407_v44, %v894_v53  ;;  %v870_v31 = vmul.f32 %v1409_v35, %v809_v0 }
 0x2fb   :  { %993 = vst [vmem:[#allocation2 + $0x58] sm:$0xff] %v968_v47  ;;  %v817_v32 = vpop.xlane.xlu0 %816 }
 0x2fc   :  { %v944_v40 = vmul.f32 %v2086_v55, %v919_v38  ;;  %v895_v57 = vsub.f32 2.0, %v870_v31  ;;  %1416 = vrcp.f32 %v817_v32 }
 0x2fd   :  { %v1411_v48 = vpop.eup %1410 }
 0x2fe   :  { %v969_v51 = vsel %vm631_vm3, %v944_v40, %v1917_v2  ;;  %v920_v17 = vmul.f32 %v1409_v35, %v895_v57  ;;  %v871_v7 = vmul.f32 %v1411_v48, %v811_v24 }
 0x2ff   :  { %994 = vst [vmem:[#allocation2 + $0x60] sm:$0xff] %v969_v51  ;;  %v819_v26 = vpop.xlane.xlu1 %818 }
 0x300   :  { %v945_v60 = vmul.f32 %v2090_v59, %v920_v17  ;;  %v896_v61 = vsub.f32 2.0, %v871_v7  ;;  %1418 = vrcp.f32 %v819_v26 }
 0x301   :  { %v1413_v36 = vpop.eup %1412 }
 0x302   :  { %v970_v55 = vsel %vm631_vm3, %v945_v60, %v1926_v6  ;;  %v921_v3 = vmul.f32 %v1411_v48, %v896_v61  ;;  %v872_v56 = vmul.f32 %v1413_v36, %v813_v5 }
 0x303   :  { %995 = vst [vmem:[#allocation2 + $0x68] sm:$0xff] %v970_v55  ;;  %v821_v20 = vpop.xlane.xlu0 %820 }
 0x304   :  { %v946_v23 = vmul.f32 %v2094_v63, %v921_v3  ;;  %v897_v2 = vsub.f32 2.0, %v872_v56  ;;  %1420 = vrcp.f32 %v821_v20  ;;  %v2255_v3 = vld [vmem:[#allocation5_spill] sm:$0xff] }
 0x305   :  { %v1415_v0 = vpop.eup %1414 }
 0x306   :  { %v971_v59 = vsel %vm631_vm3, %v946_v23, %v1935_v10  ;;  %v922_v42 = vmul.f32 %v1413_v36, %v897_v2  ;;  %v873_v41 = vmul.f32 %v1415_v0, %v815_v27 }
 0x307   :  { %996 = vst [vmem:[#allocation2 + $0x70] sm:$0xff] %v971_v59  ;;  %v823_v52 = vpop.xlane.xlu1 %822 }
 0x308   :  { %v947_v34 = vmul.f32 %v2098_v4, %v922_v42  ;;  %v898_v6 = vsub.f32 2.0, %v873_v41  ;;  %1422 = vrcp.f32 %v823_v52  ;;  %v2258_v42 = vld [vmem:[#allocation10_spill] sm:$0xff] }
 0x309   :  { %v1417_v50 = vpop.eup %1416 }
 0x30a   :  { %v972_v63 = vsel %vm631_vm3, %v947_v34, %v1944_v14  ;;  %v923_v11 = vmul.f32 %v1415_v0, %v898_v6  ;;  %v874_v24 = vmul.f32 %v1417_v50, %v817_v32 }
 0x30b   :  { %997 = vst [vmem:[#allocation2 + $0x78] sm:$0xff] %v972_v63  ;;  %v825_v58 = vpop.xlane.xlu0 %824 }
 0x30c   :  { %v948_v45 = vmul.f32 %v2102_v8, %v923_v11  ;;  %v899_v10 = vsub.f32 2.0, %v874_v24  ;;  %1424 = vrcp.f32 %v825_v58 }
 0x30d   :  { %v1419_v19 = vpop.eup %1418 }
 0x30e   :  { %v973_v4 = vsel %vm631_vm3, %v948_v45, %v1953_v21  ;;  %v924_v39 = vmul.f32 %v1417_v50, %v899_v10  ;;  %v875_v9 = vmul.f32 %v1419_v19, %v819_v26 }
 0x30f   :  { %998 = vst [vmem:[#allocation2 + $0x80] sm:$0xff] %v973_v4  ;;  %v827_v16 = vpop.xlane.xlu1 %826 }
 0x310   :  { %v949_v5 = vmul.f32 %v2106_v12, %v924_v39  ;;  %v900_v14 = vsub.f32 2.0, %v875_v9  ;;  %1426 = vrcp.f32 %v827_v16 }
 0x311   :  { %v1421_v30 = vpop.eup %1420 }
 0x312   :  { %v974_v8 = vsel %vm631_vm3, %v949_v5, %v1962_v29  ;;  %v925_v49 = vmul.f32 %v1419_v19, %v900_v14  ;;  %v876_v44 = vmul.f32 %v1421_v30, %v821_v20 }
 0x313   :  { %999 = vst [vmem:[#allocation2 + $0x88] sm:$0xff] %v974_v8  ;;  %v829_v43 = vpop.xlane.xlu0 %828 }
 0x314   :  { %v950_v28 = vmul.f32 %v2110_v18, %v925_v49  ;;  %v901_v21 = vsub.f32 2.0, %v876_v44  ;;  %1428 = vrcp.f32 %v829_v43 }
 0x315   :  { %v1423_v1 = vpop.eup %1422 }
 0x316   :  { %v975_v12 = vsel %vm631_vm3, %v950_v28, %v1971_v37  ;;  %v926_v27 = vmul.f32 %v1421_v30, %v901_v21  ;;  %v877_v13 = vmul.f32 %v1423_v1, %v823_v52  ;;  %v2259_v52 = vld [vmem:[#allocation7_spill] sm:$0xff] }
 0x317   :  { %1000 = vst [vmem:[#allocation2 + $0x90] sm:$0xff] %v975_v12  ;;  %v831_v53 = vpop.xlane.xlu1 %830 }
 0x318   :  { %v951_v35 = vmul.f32 %v2114_v25, %v926_v27  ;;  %v902_v29 = vsub.f32 2.0, %v877_v13  ;;  %1430 = vrcp.f32 %v831_v53 }
 0x319   :  { %v1425_v47 = vpop.eup %1424 }
 0x31a   :  { %v976_v18 = vsel %vm631_vm3, %v951_v35, %v1980_v46  ;;  %v927_v38 = vmul.f32 %v1423_v1, %v902_v29  ;;  %v878_v31 = vmul.f32 %v1425_v47, %v825_v58 }
 0x31b   :  { %1001 = vst [vmem:[#allocation2 + $0x98] sm:$0xff] %v976_v18 }
 0x31c   :  { %v952_v32 = vmul.f32 %v2118_v33, %v927_v38  ;;  %v903_v40 = vsub.f32 2.0, %v878_v31  ;;  %v2254_v33 = vld [vmem:[#allocation8_spill] sm:$0xff] }
 0x31d   :  { %v1427_v37 = vpop.eup %1426 }
 0x31e   :  { %v977_v57 = vsel %vm631_vm3, %v952_v32, %v1989_v54  ;;  %v928_v48 = vmul.f32 %v1425_v47, %v903_v40  ;;  %v879_v25 = vmul.f32 %v1427_v37, %v827_v16 }
 0x31f   :  { %1002 = vst [vmem:[#allocation2 + $0xa0] sm:$0xff] %v977_v57 }
 0x320   :  { %v953_v51 = vmul.f32 %v2121_v22, %v928_v48  ;;  %v904_v17 = vsub.f32 2.0, %v879_v25  ;;  %v2256_v22 = vld [vmem:[#allocation9_spill] sm:$0xff] }
 0x321   :  { %v1429_v7 = vpop.eup %1428 }
 0x322   :  { %v978_v46 = vsel %vm631_vm3, %v953_v51, %v1998_v62  ;;  %v929_v26 = vmul.f32 %v1427_v37, %v904_v17  ;;  %v880_v60 = vmul.f32 %v1429_v7, %v829_v43  ;;  %v2257_v62 = vld [vmem:[#allocation6_spill] sm:$0xff] }
 0x323   :  { %1003 = vst [vmem:[#allocation2 + $0xa8] sm:$0xff] %v978_v46 }
 0x324   :  { %v954_v61 = vmul.f32 %v2254_v33, %v929_v26  ;;  %v905_v36 = vsub.f32 2.0, %v880_v60 }
 0x325   :  { %v1431_v55 = vpop.eup %1430 }
 0x326   :  { %v979_v54 = vsel %vm631_vm3, %v954_v61, %v2255_v3  ;;  %v930_v56 = vmul.f32 %v1429_v7, %v905_v36  ;;  %v881_v20 = vmul.f32 %v1431_v55, %v831_v53 }
 0x327   :  { %1004 = vst [vmem:[#allocation2 + $0xb0] sm:$0xff] %v979_v54 }
 0x328   :  { %v955_v23 = vmul.f32 %v2256_v22, %v930_v56  ;;  %v906_v2 = vsub.f32 2.0, %v881_v20 }
 0x32a   :  { %v980_v0 = vsel %vm631_vm3, %v955_v23, %v2257_v62  ;;  %v931_v59 = vmul.f32 %v1431_v55, %v906_v2 }
 0x32b   :  { %1005 = vst [vmem:[#allocation2 + $0xb8] sm:$0xff] %v980_v0 }
 0x32c   :  { %v956_v41 = vmul.f32 %v2258_v42, %v931_v59 }
 0x32e   :  { %v981_v34 = vsel %vm631_vm3, %v956_v41, %v2259_v52 }
 0x32f   :  { %1006 = vst [vmem:[#allocation2 + $0xc0] sm:$0xff] %v981_v34 }
 0x330   :  { %1443 = shalt.err (!%p1440_p4)
}
 0x331   :  { %s1457_s17 = smov 128   ;;  %s1458_s18 = smov 8  }
 0x332   :  { %1018 = dma.vmem_to_hbm [thread:$0]  %s1013_s15, 3200, %s2241_s5, [#allocation3], %s1457_s17, %s1457_s17, %s1458_s18  }
 0x333   :  { %1452 = dma.done.wait [#allocation3], 3200  }
 0x334   :  { %1453 = vsyncadd [#allocation3], 4294964096 }
 0x335   :  { %1022 = vsyncpa [#allocation3], 1 }

</bundles_post_ra>
